<compile_context>
chip_gen: v7x
topology: tpu7x:2x2x1
jax: 0.10.0
libtpu: 0.0.40
codegen_flags: <defaults>
</compile_context>

<pallas_src>
import functools

import numpy as np
import jax
import jax.numpy as jnp
from jax import lax
from jax.experimental import pallas as pl
from jax.experimental.pallas import tpu as pltpu


def _vmem_limit(nbytes):
    return int(min(max(nbytes + (2 << 20), 4 << 20), 64 << 20))


def _pick_alpha_rows(B):
    # batch rows per alphas grid step: divides B, keeps >= 2 grid entries.
    for ab in (8, 4, 2):
        if B % ab == 0 and B // ab >= 2:
            return ab
    return 1


def _pick_scan_batch_block(B):
    # must be == B or a multiple of 8 dividing B (block-shape constraint).
    if B > 8 and B % 8 == 0:
        return 8
    return B


# ----------------------------------------------------------------------------
# Kernel 1: alphas = mask * relu(smooth * sigmoid(Linear(relu(dwconv(h)+h))) - noise)
# ----------------------------------------------------------------------------
def _alphas_kernel(ab, T, K, L, smooth_factor, noise_threshold,
                   hid_ref, mask_ref, cw_ref, cb_ref, lw_ref, lb_ref, out_ref):
    D = hid_ref.shape[2]
    cw = cw_ref[...].astype(jnp.float32)          # (K, D)
    cb = cb_ref[...].astype(jnp.float32)          # (1, D)
    lw = lw_ref[...].astype(jnp.float32)          # (1, D)
    lb = lb_ref[...].astype(jnp.float32)          # (1, 1)

    for r in range(ab):                           # ab batch rows per grid step
        h = hid_ref[r].astype(jnp.float32)        # (T, D) single read
        acc = h + cb                              # residual + conv bias
        for k in range(K):
            o = k - L                             # tap offset along time
            if o == 0:
                tap = h
            elif o > 0:                           # tap[t] = h[t+o], zero at the edge
                tap = jnp.concatenate(
                    [h[o:, :], jnp.zeros((o, D), jnp.float32)], axis=0)
            else:
                tap = jnp.concatenate(
                    [jnp.zeros((-o, D), jnp.float32), h[:T + o, :]], axis=0)
            acc = acc + tap * cw[k:k + 1, :]
        out = jnp.maximum(acc, 0.0)               # relu (dropout = identity in eval)
        # Linear(D->1) as (1,D)x(T,D)^T so the logits are already lane-dense (1,T).
        logit = lax.dot_general(lw, out, (((1,), (1,)), ((), ())),
                                preferred_element_type=jnp.float32) + lb
        a = jax.nn.sigmoid(logit)
        a = jnp.maximum(a * smooth_factor - noise_threshold, 0.0)
        out_ref[r] = a * mask_ref[r]              # lane-dense (1, T) store


def compute_alphas(hidden, mask_bt, conv_w, conv_b, lin_w, lin_b,
                   l_order, r_order, smooth_factor, noise_threshold):
    B, T, D = hidden.shape
    K = l_order + r_order + 1
    ab = _pick_alpha_rows(B)
    mask_row = mask_bt.astype(jnp.float32)[:, None, :]        # (B, 1, T)
    kernel = functools.partial(_alphas_kernel, ab, T, K, l_order,
                               smooth_factor, noise_threshold)
    blk = (ab * T * D * hidden.dtype.itemsize + 2 * ab * T * 4
           + (K + 2) * D * 4 + 4)
    vmem = _vmem_limit(2 * blk + 4 * T * D * 4)
    out = pl.pallas_call(
        kernel,
        out_shape=jax.ShapeDtypeStruct((B, 1, T), jnp.float32),
        grid=(B // ab,),
        in_specs=[
            pl.BlockSpec((ab, T, D), lambda b: (b, 0, 0)),     # hidden
            pl.BlockSpec((ab, 1, T), lambda b: (b, 0, 0)),     # mask (lane-dense)
            pl.BlockSpec((K, D), lambda b: (0, 0)),            # conv weight
            pl.BlockSpec((1, D), lambda b: (0, 0)),            # conv bias
            pl.BlockSpec((1, D), lambda b: (0, 0)),            # linear weight
            pl.BlockSpec((1, 1), lambda b: (0, 0)),            # linear bias
        ],
        out_specs=pl.BlockSpec((ab, 1, T), lambda b: (b, 0, 0)),
        compiler_params=pltpu.CompilerParams(
            dimension_semantics=("parallel",),
            vmem_limit_bytes=vmem),
    )(hidden, mask_row, conv_w, conv_b, lin_w, lin_b)
    return out[:, 0, :]                                        # (B, T)


# ----------------------------------------------------------------------------
# Kernel 2: CIF integrate-and-fire recurrence, time-major, batch on sublanes.
# ----------------------------------------------------------------------------
def _cif_kernel(tc, T, threshold,
                alp_ref, hid_ref, frames_ref, fires_ref, integ_ref, frame_ref):
    c = pl.program_id(1)                                   # time-chunk index

    @pl.when(c == 0)                                       # keyed on the TIME axis
    def _():
        integ_ref[...] = jnp.zeros_like(integ_ref)
        frame_ref[...] = jnp.zeros_like(frame_ref)

    alp = alp_ref[0].astype(jnp.float32)                   # (bb, tc) lane-dense
    integ = integ_ref[...]                                 # (bb, 1)
    frame = frame_ref[...]                                 # (bb, D)
    t_base = c * tc
    fire_vals = []
    for i in range(tc):                                    # unrolled, static slices
        h = hid_ref[i].astype(jnp.float32)                 # contiguous (bb, D) slab
        # rows at / past T are the appended zero frame or chunk padding
        h = jnp.where(t_base + i < T, h, 0.0)
        alpha = alp[:, i:i + 1]                            # (bb, 1)
        dist_comp = 1.0 - integ
        integ = integ + alpha
        fire_vals.append(integ)                            # fires before the reset
        fire = integ >= threshold
        cur = jnp.where(fire, dist_comp, alpha)
        remainds = alpha - cur
        frame = frame + cur * h
        frames_ref[i] = frame                              # frames before the reset
        frame = jnp.where(fire, remainds * h, frame)
        integ = jnp.where(fire, integ - 1.0, integ)
    fires_ref[0] = jnp.concatenate(fire_vals, axis=1)      # one lane-dense (bb, tc) store
    integ_ref[...] = integ
    frame_ref[...] = frame


def cif_scan(hidden_tm, alphas_tm, threshold, *, tc, T):
    """hidden_tm: (T, B, D); alphas_tm: (nc, B, tc).  Returns time-major outputs."""
    _, B, D = hidden_tm.shape
    nc = alphas_tm.shape[0]
    t1p = nc * tc
    nbt = pl.cdiv(T, tc)                                   # valid hidden time blocks
    bb = _pick_scan_batch_block(B)
    nb = B // bb
    kernel = functools.partial(_cif_kernel, tc, T, threshold)
    blk = (tc * bb * D * hidden_tm.dtype.itemsize + tc * bb * D * 4
           + 2 * bb * tc * 4)
    vmem = _vmem_limit(2 * blk + bb * (D + 1) * 4 + 4 * bb * D * 4)
    frames_tm, fires_tm = pl.pallas_call(
        kernel,
        out_shape=(jax.ShapeDtypeStruct((t1p, B, D), jnp.float32),
                   jax.ShapeDtypeStruct((nc, B, tc), jnp.float32)),
        grid=(nb, nc),
        in_specs=[
            pl.BlockSpec((1, bb, tc), lambda nbi, c: (c, nbi, 0)),
            # clamp the hidden block for chunks past T (those rows are masked)
            pl.BlockSpec((tc, bb, D),
                         lambda nbi, c: (jnp.minimum(c, nbt - 1), nbi, 0)),
        ],
        out_specs=(
            pl.BlockSpec((tc, bb, D), lambda nbi, c: (c, nbi, 0)),
            pl.BlockSpec((1, bb, tc), lambda nbi, c: (c, nbi, 0)),
        ),
        scratch_shapes=[pltpu.VMEM((bb, 1), jnp.float32),   # integrate carry
                        pltpu.VMEM((bb, D), jnp.float32)],  # frame carry
        compiler_params=pltpu.CompilerParams(
            dimension_semantics=("parallel", "arbitrary"),
            vmem_limit_bytes=vmem),
    )(alphas_tm, hidden_tm)
    return frames_tm, fires_tm


# ----------------------------------------------------------------------------
# Full forward (inference path: no target labels, tail_threshold > 0, mask given)
# ----------------------------------------------------------------------------
def cif_predictor_forward(hidden, mask_bt, params, *, l_order, r_order,
                          threshold=1.0, smooth_factor=1.0,
                          noise_threshold=0.0, tail_threshold=0.45, tc=32):
    mask_bt = mask_bt.astype(jnp.float32)
    B, T, D = hidden.shape

    alphas = compute_alphas(hidden, mask_bt,
                            params["conv_w"], params["conv_b"],
                            params["lin_w"], params["lin_b"],
                            l_order, r_order, smooth_factor, noise_threshold)

    # tail_process_fn (cheap elementwise glue, left to XLA)
    zeros_t = jnp.zeros((B, 1), jnp.float32)
    ones_t = jnp.ones((B, 1), jnp.float32)
    mask_1 = jnp.concatenate([mask_bt, zeros_t], axis=1)
    mask_2 = jnp.concatenate([ones_t, mask_bt], axis=1)
    tail_mask = (mask_2 - mask_1) * tail_threshold
    alphas_ext = jnp.concatenate([alphas, zeros_t], axis=1) + tail_mask  # (B, T1)
    token_num = jnp.floor(jnp.sum(alphas_ext, axis=-1))

    T1 = T + 1
    tc_eff = max(1, min(tc, T))
    nc = pl.cdiv(T1, tc_eff)
    t1p = nc * tc_eff

    # alphas: pad to a multiple of tc and reshape time-major (tiny tensor).
    if t1p > T1:
        alphas_pad = jnp.concatenate(
            [alphas_ext, jnp.zeros((B, t1p - T1), jnp.float32)], axis=1)
    else:
        alphas_pad = alphas_ext
    alphas_tm = alphas_pad.reshape(B, nc, tc_eff).transpose(1, 0, 2)   # (nc, B, tc)
    # hidden: single transpose to time-major (replaces the old zero-pad copy);
    # the appended zero tail frame is realized by masking t >= T in-kernel.
    hidden_tm = jnp.transpose(hidden, (1, 0, 2))                       # (T, B, D)

    frames_tm, fires_tm = cif_scan(hidden_tm, alphas_tm, threshold,
                                   tc=tc_eff, T=T)

    fires_bt = fires_tm.transpose(1, 0, 2).reshape(B, t1p)[:, :T1]     # (B, T1)
    frames_tbd = frames_tm[:T1]                                        # (T1, B, D)

    # Fired-frame compaction via a one-hot matmul (no XLA scatter/gather).
    fired = fires_bt >= threshold                  # exact f32 compare (pre-reset values)
    pos = jnp.cumsum(fired.astype(jnp.int32), axis=1) - 1

    # Single combined device->host sync for the data-dependent output length.
    len_labels = jnp.round(jnp.sum(alphas_ext, axis=-1)).astype(jnp.int32)
    maxes = jnp.stack([jnp.max(len_labels), jnp.max(token_num).astype(jnp.int32)])
    maxes_np = np.asarray(jax.device_get(maxes))
    out_len = max(min(int(maxes_np[0]), int(maxes_np[1])), 0)

    j_idx = jnp.arange(out_len, dtype=jnp.int32)
    sel = jnp.logical_and(pos[:, None, :] == j_idx[None, :, None],
                          fired[:, None, :]).astype(jnp.float32)       # (B, J, T1)
    acoustic_embeds = jnp.einsum('bjt,tbd->bjd', sel, frames_tbd,
                                 precision=lax.Precision.HIGHEST)

    return acoustic_embeds, token_num, alphas_ext, fires_bt


# ----------------------------------------------------------------------------
# Pure numpy reference (same math) for a correctness check
# ----------------------------------------------------------------------------
def reference_forward(hidden, mask_bt, params, l_order, r_order, threshold,
                      smooth_factor, noise_threshold, tail_threshold):
    hidden = np.asarray(hidden, np.float32)
    mask_bt = np.asarray(mask_bt, np.float32)
    cw = np.asarray(params["conv_w"])
    cb = np.asarray(params["conv_b"])[0]
    lw = np.asarray(params["lin_w"])
    lb = float(np.asarray(params["lin_b"])[0, 0])
    B, T, D = hidden.shape
    K = l_order + r_order + 1
    padded = np.pad(hidden, ((0, 0), (l_order, r_order), (0, 0)))
    conv = np.zeros((B, T, D), np.float32)
    for k in range(K):
        conv += padded[:, k:k + T, :] * cw[k][None, None, :]
    conv += cb[None, None, :]
    out = np.maximum(conv + hidden, 0.0)
    logit = out @ lw.T + lb
    a = 1.0 / (1.0 + np.exp(-logit))
    a = np.maximum(a * smooth_factor - noise_threshold, 0.0)
    alphas = (a[..., 0] * mask_bt).astype(np.float32)

    zeros_t = np.zeros((B, 1), np.float32)
    ones_t = np.ones((B, 1), np.float32)
    tail = (np.concatenate([ones_t, mask_bt], 1)
            - np.concatenate([mask_bt, zeros_t], 1)) * tail_threshold
    alphas_ext = np.concatenate([alphas, zeros_t], 1) + tail
    hidden_ext = np.concatenate([hidden, np.zeros((B, 1, D), np.float32)], 1)
    token_num = np.floor(alphas_ext.sum(-1))

    T1 = T + 1
    integrate = np.zeros((B,), np.float32)
    frame = np.zeros((B, D), np.float32)
    fires = np.zeros((B, T1), np.float32)
    frames = np.zeros((B, T1, D), np.float32)
    for t in range(T1):
        alpha = alphas_ext[:, t]
        dist = 1.0 - integrate
        integrate = integrate + alpha
        fires[:, t] = integrate
        fire = integrate >= threshold
        cur = np.where(fire, dist, alpha)
        rem = alpha - cur
        frame = frame + cur[:, None] * hidden_ext[:, t, :]
        frames[:, t, :] = frame
        frame = np.where(fire[:, None], rem[:, None] * hidden_ext[:, t, :], frame)
        integrate = np.where(fire, integrate - 1.0, integrate)

    len_labels = np.round(alphas_ext.sum(-1)).astype(np.int32)
    max_label_len = int(len_labels.max())
    outs = []
    for b in range(B):
        sel = frames[b][fires[b] >= threshold]
        pad = np.zeros((max_label_len - sel.shape[0], D), np.float32)
        outs.append(np.concatenate([sel, pad], 0))
    ae = np.stack(outs, 0)[:, :int(token_num.max()), :]
    return alphas_ext, token_num, fires, frames, ae


if __name__ == "__main__":
    B, T, D = 2, 16, 32            # idim = 32
    l_order, r_order = 1, 1
    K = l_order + r_order + 1

    key = jax.random.PRNGKey(0)
    k1, k2, k3, k4, k5 = jax.random.split(key, 5)
    hidden = jax.random.normal(k1, (B, T, D), jnp.float32)
    # conv_w[k, d] == torch depthwise weight[d, 0, k]; lin_w matches torch (1, idim)
    params = {
        "conv_w": 0.3 * jax.random.normal(k2, (K, D), jnp.float32),
        "conv_b": 0.1 * jax.random.normal(k3, (1, D), jnp.float32),
        "lin_w": 0.3 * jax.random.normal(k4, (1, D), jnp.float32),
        "lin_b": 0.1 * jax.random.normal(k5, (1, 1), jnp.float32),
    }
    # mask: batch 0 fully valid, batch 1 has 12 valid frames
    mask_bt = jnp.concatenate(
        [jnp.ones((1, T), jnp.float32),
         jnp.concatenate([jnp.ones((1, 12), jnp.float32),
                          jnp.zeros((1, T - 12), jnp.float32)], axis=1)],
        axis=0)

    acoustic_embeds, token_num, alphas_ext, cif_peak = cif_predictor_forward(
        hidden, mask_bt, params, l_order=l_order, r_order=r_order,
        threshold=1.0, smooth_factor=1.0, noise_threshold=0.0,
        tail_threshold=0.45)
    jax.block_until_ready((acoustic_embeds, token_num, alphas_ext, cif_peak))

    ref_alphas, ref_token_num, ref_fires, ref_frames, ref_ae = reference_forward(
        hidden, mask_bt, params, l_order, r_order, 1.0, 1.0, 0.0, 0.45)

    assert np.allclose(np.asarray(alphas_ext), ref_alphas, atol=2e-4, rtol=2e-3)
    assert np.allclose(np.asarray(cif_peak), ref_fires, atol=2e-4, rtol=2e-3)
    assert np.allclose(np.asarray(token_num), ref_token_num, atol=1e-3)
    assert acoustic_embeds.shape == ref_ae.shape
    assert np.allclose(np.asarray(acoustic_embeds), ref_ae, atol=2e-3, rtol=2e-3)
    print("KERNEL_OK")
</pallas_src>

<mosaic_0001>
module attributes {stable_mosaic.version = 11 : i64} {
  func.func @_alphas_kernel(%arg0: i32, %arg1: memref<1x16x32xf32, #tpu.memory_space<vmem>>, %arg2: memref<1x1x16xf32, #tpu.memory_space<vmem>>, %arg3: memref<3x32xf32, #tpu.memory_space<vmem>>, %arg4: memref<1x32xf32, #tpu.memory_space<vmem>>, %arg5: memref<1x32xf32, #tpu.memory_space<vmem>>, %arg6: memref<1x1xf32, #tpu.memory_space<vmem>>, %arg7: memref<1x1x16xf32, #tpu.memory_space<vmem>>) attributes {dimension_semantics = [#tpu.dimension_semantics<parallel>], iteration_bounds = array<i64: 2>, scalar_prefetch = 0 : i64, scratch_operands = 0 : i64, tpu.core_type = #tpu.core_type<tc>, window_params = [{transform_indices = @transform_0, window_bounds = array<i64: 1, 16, 32>}, {transform_indices = @transform_1, window_bounds = array<i64: 1, 1, 16>}, {pipeline_mode = #tpu.pipeline_mode<synchronous>, transform_indices = @transform_2, window_bounds = array<i64: 3, 32>}, {pipeline_mode = #tpu.pipeline_mode<synchronous>, transform_indices = @transform_3, window_bounds = array<i64: 1, 32>}, {pipeline_mode = #tpu.pipeline_mode<synchronous>, transform_indices = @transform_4, window_bounds = array<i64: 1, 32>}, {pipeline_mode = #tpu.pipeline_mode<synchronous>, transform_indices = @transform_5, window_bounds = array<i64: 1, 1>}, {transform_indices = @transform_6, window_bounds = array<i64: 1, 1, 16>}]} {
    %c0 = arith.constant 0 : index
    %c0_0 = arith.constant 0 : index
    %0 = vector.load %arg3[%c0, %c0_0] : memref<3x32xf32, #tpu.memory_space<vmem>>, vector<3x32xf32>
    %c0_1 = arith.constant 0 : index
    %c0_2 = arith.constant 0 : index
    %1 = vector.load %arg4[%c0_1, %c0_2] : memref<1x32xf32, #tpu.memory_space<vmem>>, vector<1x32xf32>
    %c0_3 = arith.constant 0 : index
    %c0_4 = arith.constant 0 : index
    %2 = vector.load %arg5[%c0_3, %c0_4] : memref<1x32xf32, #tpu.memory_space<vmem>>, vector<1x32xf32>
    %c0_5 = arith.constant 0 : index
    %c0_6 = arith.constant 0 : index
    %3 = vector.load %arg6[%c0_5, %c0_6] : memref<1x1xf32, #tpu.memory_space<vmem>>, vector<1x1xf32>
    %c0_7 = arith.constant 0 : index
    %c0_8 = arith.constant 0 : index
    %c0_9 = arith.constant 0 : index
    %4 = vector.load %arg1[%c0_7, %c0_8, %c0_9] : memref<1x16x32xf32, #tpu.memory_space<vmem>>, vector<1x16x32xf32>
    %5 = vector.shape_cast %4 : vector<1x16x32xf32> to vector<16x32xf32>
    %6 = vector.broadcast %1 : vector<1x32xf32> to vector<16x32xf32>
    %7 = arith.addf %5, %6 : vector<16x32xf32>
    %cst = arith.constant 0.000000e+00 : f32
    %8 = vector.broadcast %cst : f32 to vector<1x32xf32>
    %9 = vector.extract_strided_slice %5 {offsets = [0, 0], sizes = [15, 32], strides = [1, 1]} : vector<16x32xf32> to vector<15x32xf32>
    %10 = tpu.concatenate %8, %9 in 0 : vector<1x32xf32>, vector<15x32xf32> -> vector<16x32xf32>
    %11 = vector.extract_strided_slice %0 {offsets = [0, 0], sizes = [1, 32], strides = [1, 1]} : vector<3x32xf32> to vector<1x32xf32>
    %12 = vector.broadcast %11 : vector<1x32xf32> to vector<16x32xf32>
    %13 = arith.mulf %10, %12 : vector<16x32xf32>
    %14 = arith.addf %7, %13 : vector<16x32xf32>
    %15 = vector.extract_strided_slice %0 {offsets = [1, 0], sizes = [1, 32], strides = [1, 1]} : vector<3x32xf32> to vector<1x32xf32>
    %16 = vector.broadcast %15 : vector<1x32xf32> to vector<16x32xf32>
    %17 = arith.mulf %5, %16 : vector<16x32xf32>
    %18 = arith.addf %14, %17 : vector<16x32xf32>
    %19 = vector.extract_strided_slice %5 {offsets = [1, 0], sizes = [15, 32], strides = [1, 1]} : vector<16x32xf32> to vector<15x32xf32>
    %cst_10 = arith.constant 0.000000e+00 : f32
    %20 = vector.broadcast %cst_10 : f32 to vector<1x32xf32>
    %21 = tpu.concatenate %19, %20 in 0 : vector<15x32xf32>, vector<1x32xf32> -> vector<16x32xf32>
    %22 = vector.extract_strided_slice %0 {offsets = [2, 0], sizes = [1, 32], strides = [1, 1]} : vector<3x32xf32> to vector<1x32xf32>
    %23 = vector.broadcast %22 : vector<1x32xf32> to vector<16x32xf32>
    %24 = arith.mulf %21, %23 : vector<16x32xf32>
    %25 = arith.addf %18, %24 : vector<16x32xf32>
    %cst_11 = arith.constant 0.000000e+00 : f32
    %26 = vector.broadcast %cst_11 : f32 to vector<16x32xf32>
    %27 = arith.maximumf %25, %26 : vector<16x32xf32>
    %cst_12 = arith.constant dense<0.000000e+00> : vector<1x16xf32>
    %28 = tpu.matmul %2, %27, %cst_12 {dimension_numbers = #tpu.dot_dimension_numbers<[1], [1], [0], [0], [0, 0, 1, 0], [], []>} : vector<1x32xf32>, vector<16x32xf32>, vector<1x16xf32> -> vector<1x16xf32>
    %29 = vector.broadcast %3 : vector<1x1xf32> to vector<1x16xf32>
    %30 = arith.addf %28, %29 : vector<1x16xf32>
    %31 = arith.negf %30 : vector<1x16xf32>
    %32 = math.exp %31 : vector<1x16xf32>
    %cst_13 = arith.constant 1.000000e+00 : f32
    %33 = vector.broadcast %cst_13 : f32 to vector<1x16xf32>
    %34 = arith.addf %33, %32 : vector<1x16xf32>
    %35 = arith.divf %33, %34 : vector<1x16xf32>
    %cst_14 = arith.constant 1.000000e+00 : f32
    %36 = vector.broadcast %cst_14 : f32 to vector<1x16xf32>
    %37 = arith.mulf %35, %36 : vector<1x16xf32>
    %cst_15 = arith.constant 0.000000e+00 : f32
    %38 = vector.broadcast %cst_15 : f32 to vector<1x16xf32>
    %39 = arith.subf %37, %38 : vector<1x16xf32>
    %cst_16 = arith.constant 0.000000e+00 : f32
    %40 = vector.broadcast %cst_16 : f32 to vector<1x16xf32>
    %41 = arith.maximumf %39, %40 : vector<1x16xf32>
    %c0_17 = arith.constant 0 : index
    %c0_18 = arith.constant 0 : index
    %c0_19 = arith.constant 0 : index
    %42 = vector.load %arg2[%c0_17, %c0_18, %c0_19] : memref<1x1x16xf32, #tpu.memory_space<vmem>>, vector<1x1x16xf32>
    %43 = vector.shape_cast %42 : vector<1x1x16xf32> to vector<1x16xf32>
    %44 = arith.mulf %41, %43 : vector<1x16xf32>
    %c0_20 = arith.constant 0 : index
    %c0_21 = arith.constant 0 : index
    %c0_22 = arith.constant 0 : index
    %45 = vector.load %arg7[%c0_20, %c0_21, %c0_22] : memref<1x1x16xf32, #tpu.memory_space<vmem>>, vector<1x1x16xf32>
    %46 = vector.shape_cast %45 : vector<1x1x16xf32> to vector<1x16xf32>
    %47 = vector.shape_cast %44 : vector<1x16xf32> to vector<1x1x16xf32>
    tpu.vector_store %arg7[%c0_20, %c0_21, %c0_22], %47 {strides = array<i32>} : memref<1x1x16xf32, #tpu.memory_space<vmem>>, vector<1x1x16xf32>,
    return
  }
  func.func @transform_0(%arg0: i32) -> (i32, i32, i32) {
    %c0_i32 = arith.constant 0 : i32
    %c0_i32_0 = arith.constant 0 : i32
    %c0_i32_1 = arith.constant 0 : i32
    return %arg0, %c0_i32, %c0_i32_0 : i32, i32, i32
  }
  func.func @transform_1(%arg0: i32) -> (i32, i32, i32) {
    %c0_i32 = arith.constant 0 : i32
    %c0_i32_0 = arith.constant 0 : i32
    %c0_i32_1 = arith.constant 0 : i32
    return %arg0, %c0_i32, %c0_i32_0 : i32, i32, i32
  }
  func.func @transform_2(%arg0: i32) -> (i32, i32) {
    %c0_i32 = arith.constant 0 : i32
    %c0_i32_0 = arith.constant 0 : i32
    %c0_i32_1 = arith.constant 0 : i32
    return %c0_i32, %c0_i32_0 : i32, i32
  }
  func.func @transform_3(%arg0: i32) -> (i32, i32) {
    %c0_i32 = arith.constant 0 : i32
    %c0_i32_0 = arith.constant 0 : i32
    %c0_i32_1 = arith.constant 0 : i32
    return %c0_i32, %c0_i32_0 : i32, i32
  }
  func.func @transform_4(%arg0: i32) -> (i32, i32) {
    %c0_i32 = arith.constant 0 : i32
    %c0_i32_0 = arith.constant 0 : i32
    %c0_i32_1 = arith.constant 0 : i32
    return %c0_i32, %c0_i32_0 : i32, i32
  }
  func.func @transform_5(%arg0: i32) -> (i32, i32) {
    %c0_i32 = arith.constant 0 : i32
    %c0_i32_0 = arith.constant 0 : i32
    %c0_i32_1 = arith.constant 0 : i32
    return %c0_i32, %c0_i32_0 : i32, i32
  }
  func.func @transform_6(%arg0: i32) -> (i32, i32, i32) {
    %c0_i32 = arith.constant 0 : i32
    %c0_i32_0 = arith.constant 0 : i32
    %c0_i32_1 = arith.constant 0 : i32
    return %arg0, %c0_i32, %c0_i32_0 : i32, i32, i32
  }
}

</mosaic_0001>

<bundles_post_ra>
// kernel: tpu_custom_call.1
= control target key start
LH: loop header
LB: loop body
LE: loop exit
PB: predicated region body
PF: predicated region fallthrough
CT: control target
= control target key end

     0   :  { %s938_s0 = inlined_call_operand.hbm [shape: f32[2,16,32], index: 0, kind: input, shape index: {}]   ;;  %s939_s1 = inlined_call_operand.vmem [shape: f32[2,1,16], index: 1, kind: input, shape index: {}]   ;;  %s940_s2 = inlined_call_operand.vmem [shape: f32[3,32], index: 2, kind: input, shape index: {}]   ;;  %s941_s3 = inlined_call_operand.vmem [shape: f32[1,32], index: 3, kind: input, shape index: {}]   ;;  %s942_s4 = inlined_call_operand.vmem [shape: f32[1,32], index: 4, kind: input, shape index: {}]   ;;  %s943_s5 = inlined_call_operand.<no memory space> [shape: f32[1,1], index: 5, kind: input, shape index: {}]   ;;  %s944_s6 = inlined_call_operand.hbm [shape: f32[2,1,16], index: 6, kind: output, shape index: {}]  }
   0x1   :  { %v11_v0 = vstv %s943_s5 }
   0x2   :  { %12 = vst [vmem:[#allocation2] sm:$0x1] %v11_v0 }
   0x3   :  { %13 = vsyncpa [#allocation4], 0 }
   0x4   :  { %15 = vsyncpa [#allocation4 + $0x1], 0 }
   0x5   :  { %16 = vsyncpa [#allocation5], 0 }
   0x6   :  { %18 = vsyncpa [#allocation5 + $0x1], 0  ;;  %s761_s23 = smov 0   ;;  %s763_s24 = smov 0  }
   0x7   :  { %s765_s25 = smov 0   ;;  %s767_s26 = smov 0  }
   0x8 LB: > { %s782_s5 = sadd.s32 4294967295, %s713_s26   ;;  %s529_s27 = sadd.s32 4294967294, %s713_s26   ;;  %s713_s26 = sphi %s767_s26, %s957_s26   ;;  %s709_s25 = sphi %s765_s25, %s956_s25   ;;  %s705_s24 = sphi %s763_s24, %s955_s24   ;;  %s701_s23 = sphi %s761_s23, %s954_s23  }
   0x9   : > { %s786_s28 = sadd.s32 1, %s713_s26   ;;  %s31_s29 = sadd.s32 1, %s709_s25 }
   0xa   : > { %s28_s30 = ssub.s32 %s713_s26, %s786_s28  ;;  %p38_p0 = scmp.ne.s32.totalorder %s709_s25, %s705_s24 }
   0xb   : > { %p29_p1 = scmp.eq.s32.totalorder %s28_s30, 0  ;;  %p39_p2 = scmp.eq.s32.totalorder %s713_s26, 0 }
   0xc   : > { %p44_p3 = scmp.ne.s32.totalorder %s705_s24, %s701_s23  ;;  %p45_p4 = scmp.eq.s32.totalorder %s782_s5, 0 }
   0xd   : > { %s798_s7 = scalar_select %p29_p1, %s709_s25, %s31_s29  }
   0xe   : > { %p800_p5 = por %p39_p2, %p38_p0  ;;  %p804_p6 = por %p45_p4, %p44_p3 }
   0xf   : > { %p178_p7 = scmp.eq.s32.totalorder %s782_s5, 1  ;;  %p184_p8 = scmp.eq.s32.totalorder %s529_s27, 1 }
  0x10   : > { %p572_p10 = scmp.lt.s32.totalorder %s713_s26, 2  ;;  %s216_s12 = sand.u32 1, %s709_s25  }
  0x11   : > { %p811_p11 = por %p178_p7, %p38_p0  ;;  %p815_p12 = por %p184_p8, %p44_p3 }
  0x12   : > { %s545_s13 = sshll.u32 %s713_s26, 8  ;;  %s532_s14 = sshll.u32 %s216_s12, 4 }
  0x13   : > { %s948_s10 = scalar_select %p811_p11, 1, 0 }
  0x14   : > { %s949_s11 = scalar_select %p815_p12, 1, 0 }
  0x15   : > { %s824_s17 = scalar_lea.hbm %s938_s0, %s545_s13  ;;  %s220_s18 = scalar_lea.vmem [#allocation3], %s532_s14 }
  0x16   : > { %s227_s19 = sshll.u32 %s220_s18, 4  ;;  %p828_p13 = pnand %p572_p10, %p800_p5  ;;  %s832_s19 = int_to_ptr.vmem [resolvable:$true] %s227_s19 }
  0x17   : > { %s834_s21 = scalar_lea.sflag [#allocation4], %s216_s12  ;;  %s617_s22 = scalar_lea.hbm %s824_s17, 256 }
  0x18   : > { %p618_p0 = scmp.ne.s32.totalorder %s824_s17, %s617_s22  ;;  %p619_p1 = pneg %p828_p13 }
  0x19   : > { %s622_s30 = scalar_lea.hbm %s938_s0, 512  ;;  %p623_p4 = scmp.lt.u32.totalorder %s824_s17, %s938_s0 }
  0x1a   : > { %p620_p2 = pnand %p619_p1, %p618_p0  ;;  %p624_p5 = scmp.lt.u32.totalorder %s622_s30, %s617_s22 }
  0x1b   : > { %p626_p8 = scmp.lt.u32.totalorder %s617_s22, %s824_s17 }
  0x1c   : > { %p621_p3 = pneg %p620_p2  ;;  %p625_p7 = por %p624_p5, %p623_p4 }
  0x1e   : > { %p627_p10 = por %p626_p8, %p625_p7 }
  0x20   : > { %p628_p9 = pnand %p627_p10, %p621_p3 }
  0x22   : > { %631 = shalt.err (!%p628_p9)
}
  0x23   : > { %s632_s12 = scalar_lea.vmem %s832_s19, 256  ;;  %s715_s14 = smov [#allocation3]  }
  0x24   : > { %p633_p0 = scmp.ne.s32.totalorder %s832_s19, %s632_s12  ;;  %s637_s15 = sshll.u32 %s715_s14, 4  ;;  %s638_s15 = int_to_ptr.vmem [resolvable:$false] %s637_s15 }
  0x25   : > { %s639_s16 = scalar_lea.vmem %s638_s15, 512  ;;  %p640_p11 = scmp.lt.s32.totalorder %s832_s19, %s638_s15 }
  0x26   : > { %p635_p2 = pnand %p633_p0, %p619_p1  ;;  %p641_p4 = scmp.lt.s32.totalorder %s639_s16, %s632_s12 }
  0x28   : > { %p636_p12 = pneg %p635_p2  ;;  %p642_p5 = por %p641_p4, %p640_p11 }
  0x2a   : > { %p643_p7 = pnand %p642_p5, %p636_p12 }
  0x2c   : > { %646 = shalt.err (!%p643_p7)
}
  0x2d   : > { %s716_s18 = smov 128   ;;  %s717_s22 = smov 8  }
  0x2e   : > { %567 = dma.hbm_to_vmem [thread:$0]  (!%p828_p13), %s824_s17, 256, %s832_s19, %s834_s21, %s716_s18, %s716_s18, %s717_s22  }
  0x2f   : > { %p535_p9 = scmp.ge.s32.totalorder %s713_s26, 1  ;;  %p241_p1 = scmp.lt.s32.totalorder %s713_s26, 3 }
  0x31   : > { %p242_p3 = pnand %p535_p9, %p241_p1 }
  0x32   : > { %s865_s27 = sand.u32 (!%p242_p3), 1, %s705_s24  }
  0x33   : > { %245 = sbr.rel (%p242_p3) target bundleno = 344 (0x158), region = 44  ;;  %s536_s29 = sshll.u32 (!%p242_p3), %s865_s27, 4 }
  0x34   : > { %s248_s30 = scalar_lea.sflag (!%p242_p3), [#allocation4], %s865_s27  ;;  %s251_s8 = scalar_lea.vmem (!%p242_p3), [#allocation3], %s536_s29 }
  0x3a   : > { %692 = dma.done.wait (%p804_p6), %s248_s30, 256  }
  0x3b   : > { %694 = vsyncadd (%p804_p6), %s248_s30, 4294967040  ;;  %v308_v1 = vlaneseq  ;;  %v718_v2 = vmov 0.0|0.0   ;;  %vm719_vm0 = vmmov 0   ;;  %v720_v4 = vmov 0.0   ;;  %v285_v9 = vld [vmem:[%s940_s2] sm:$0x7] }
  0x3c   : > { %556 = vmatprep.subr.bf16.mxu0 %v718_v2  ;;  %553 = vmatprep.mubr.msk.f32.mxu0 %vm719_vm0, %v720_v4  ;;  %v721_v5 = vmov 0   ;;  %v537_v10 = vld [vmem:[%s941_s3] ss:$0 sm:$0xff]  ;;  %v289_v11 = vld [vmem:[%s251_s8] sm:$0xff]  ;;  %vm301_vm1 = vcmask 1040384   ;;  %vm324_vm2 = vcmask 1046528  }
  0x3d   : > { %v309_v3 = vshrl.u32 %v308_v1, 7  ;;  %612 = vset.pattern.permute.xlu0 %v721_v5  ;;  %v290_v12 = vld [vmem:[%s251_s8 + $0x8] sm:$0xff]  ;;  %v302_v13 = vrot.slane %v289_v11, 7  ;;  %v297_v17 = vadd.f32 %v537_v10, %v289_v11  ;;  %v325_v19 = vrot.slane %v289_v11, 1  ;;  %p282_p6 = scmp.lt.s32.totalorder %s782_s5, 1  ;;  %s542_s18 = sshll.u32 %s782_s5, 4 }
  0x3e   : > { %v288_v16 = vld [vmem:[#allocation2] sm:$0x1]  ;;  %v303_v18 = vrot.slane %v290_v12, 7  ;;  %v326_v20 = vrot.slane %v290_v12, 1  ;;  %v298_v21 = vadd.f32 %v537_v10, %v290_v12  ;;  %vm350_vm3 = vcmask 261120   ;;  %s281_s22 = scalar_lea.vmem [#allocation6], %s865_s27  ;;  %s894_s17 = scalar_lea.hbm %s944_s6, %s542_s18 }
  0x3f   : > { %v310_v6 = vsub.s32 0, %v309_v3  ;;  %v318_v7 = vsub.s32 1, %v309_v3  ;;  %v333_v8 = vsub.s32 2, %v309_v3  ;;  %343 = vperm.xlu0 %612, %v288_v16   ;;  %v307_v22 = vsel %vm301_vm1, 0.0, %v302_v13  ;;  %vm558_vm4 = vmpackc.low %vm350_vm3, %vm350_vm3  ;;  %v287_v42 = vld [vmem:[%s942_s4] sm:$0x1] }
  0x40   : > { %v304_v25 = vsel %vm301_vm1, %v302_v13, %v303_v18  ;;  %v327_v27 = vsel %vm324_vm2, %v325_v19, %v326_v20  ;;  %v330_v28 = vsel %vm324_vm2, %v326_v20, 0.0  ;;  %s283_s12 = scalar_select %p282_p6, %s782_s5, 1  ;;  %vm439_vm5 = vcmask 122880  }
  0x41   : > { %v311_v14 = vrot.slane %v285_v9, %v310_v6  ;;  %v319_v15 = vrot.slane %v285_v9, %v318_v7  ;;  %v334_v24 = vrot.slane %v285_v9, %v333_v8  ;;  %s454_s29 = sshll.u32 %s281_s22, 4  ;;  %s442_s19 = scalar_lea.sflag [#allocation5], %s865_s27  ;;  %s896_s29 = int_to_ptr.vmem [resolvable:$true] %s454_s29 }
  0x42   : > { %s284_s16 = scalar_lea.vmem %s939_s1, %s283_s12  ;;  %s647_s20 = scalar_lea.vmem %s896_s29, 16 }
  0x43   : > { %v320_v23 = vmul.f32 %v319_v15, %v289_v11  ;;  %v312_v26 = vmul.f32 %v311_v14, %v307_v22  ;;  %v313_v29 = vmul.f32 %v311_v14, %v304_v25  ;;  %v321_v30 = vmul.f32 %v319_v15, %v290_v12  ;;  %v437_v52 = vld [vmem:[%s284_s16] sm:$0x1]  ;;  %p648_p11 = scmp.ne.s32.totalorder %s896_s29, %s647_s20  ;;  %p951_p12 = scmp.ne.s32.totalorder %s948_s10, 0 }
  0x44   : > { %v335_v32 = vmul.f32 %v334_v24, %v327_v27  ;;  %v336_v34 = vmul.f32 %v334_v24, %v330_v28  ;;  %s722_s5 = smov [#allocation6]  }
  0x45   : > { %v314_v31 = vadd.f32 %v312_v26, %v297_v17  ;;  %v315_v33 = vadd.f32 %v313_v29, %v298_v21  ;;  %p649_p13 = pnand %p648_p11, %p951_p12  ;;  %s651_s21 = sshll.u32 %s722_s5, 4  ;;  %s652_s21 = int_to_ptr.vmem [resolvable:$false] %s651_s21 }
  0x46   : > { %s653_s9 = scalar_lea.vmem %s652_s21, 32  ;;  %p654_p10 = scmp.lt.s32.totalorder %s896_s29, %s652_s21 }
  0x47   : > { %v322_v35 = vadd.f32 %v320_v23, %v314_v31  ;;  %v323_v36 = vadd.f32 %v321_v30, %v315_v33  ;;  %p650_p8 = pneg %p649_p13  ;;  %p655_p0 = scmp.lt.s32.totalorder %s653_s9, %s647_s20 }
  0x49   : > { %v337_v37 = vadd.f32 %v335_v32, %v322_v35  ;;  %v338_v38 = vadd.f32 %v336_v34, %v323_v36  ;;  %p656_p2 = por %p655_p0, %p654_p10 }
  0x4b   : > { %v339_v39 = vmax.f32 %v337_v37, 0.0  ;;  %v340_v40 = vmax.f32 %v338_v38, 0.0  ;;  %p657_p4 = pnand %p656_p2, %p650_p8 }
  0x4d   : > { %v557_v41 = vpack.c.bf16 %v340_v40, %v339_v39 }
  0x4f   : > { %559 = vmatpush3.bf16.xpose.msk.msra.mxu0 %vm558_vm4, %v557_v41 }
  0x56   : > { %554 = vmatmul.mubr.msk.f32.vlgmr.msra.gmra.mrb[0].mxu0 %vm350_vm3, %v287_v42 }
  0xbe   : > { %v344_v43 = vpop.permute.xlu0 %343 }
  0xbf   : > { %v349_v44 = vrot.slane %v344_v43, %v310_v6 }
 0x129   : > { %v426_v45 = vpop.f32.mrb[0].mxu0 }
 0x12a   : > { %v427_v46 = vadd.f32 %v426_v45, %v349_v44  ;;  %v555_v47 = vpop.f32.mrb[1].mxu0 }
 0x12c   : > { %v541_v48 = vmul.f32 -1.442695, %v427_v46 }
 0x12e   : > { %613 = vpow2.f32 %v541_v48 }
 0x138   : > { %v614_v49 = vpop.eup %613 }
 0x139   : > { %v433_v50 = vadd.f32 1.0, %v614_v49 }
 0x13b   : > { %615 = vrcp.f32 %v433_v50 }
 0x145   : > { %v616_v51 = vpop.eup %615 }
 0x146   : > { %v436_v53 = vmax.f32 %v616_v51, 0.0 }
 0x148   : > { %v438_v54 = vmul.f32 %v437_v52, %v436_v53 }
 0x14a   : > { %440 = vst.msk [vmem:[%s281_s22] sm:$0x1] %vm439_vm5, %v438_v54 }
 0x14b   : > { %660 = shalt.err (!%p657_p4)
}
 0x14c   : > { %s661_s27 = scalar_lea.hbm %s894_s17, 16  ;;  %s665_s14 = scalar_lea.hbm %s944_s6, 32 }
 0x14d   : > { %p662_p5 = scmp.ne.s32.totalorder %s894_s17, %s661_s27  ;;  %p666_p1 = scmp.lt.u32.totalorder %s894_s17, %s944_s6 }
 0x14e   : > { %p667_p3 = scmp.lt.u32.totalorder %s665_s14, %s661_s27  ;;  %p669_p11 = scmp.lt.u32.totalorder %s661_s27, %s894_s17 }
 0x14f   : > { %p663_p7 = pnand %p662_p5, %p951_p12 }
 0x150   : > { %p668_p6 = por %p667_p3, %p666_p1 }
 0x151   : > { %p664_p9 = pneg %p663_p7 }
 0x152   : > { %p670_p13 = por %p669_p11, %p668_p6 }
 0x154   : > { %p671_p8 = pnand %p670_p13, %p664_p9 }
 0x156   : > { %674 = shalt.err (!%p671_p8)
}
 0x157   : > { %562 = dma.vmem_to_hbm [thread:$0]  (%p951_p12), %s896_s29, 16, %s894_s17, %s442_s19  }
 0x158 PF: > { %s466_s18 = sand.u32 1, %s701_s23   ;;  %p952_p10 = scmp.ne.s32.totalorder %s949_s11, 0 }
 0x159   : > { %p953_p0 = scmp.ge.s32.totalorder %s713_s26, 2  ;;  %s467_s22 = scalar_lea.sflag [#allocation5], %s466_s18 }
 0x15b   : > { %p569_p2 = pnand %p953_p0, %p952_p10 }
 0x15d   : > { %696 = dma.done.wait (!%p569_p2), %s467_s22, 16  }
 0x15e   : > { %698 = vsyncadd (!%p569_p2), %s467_s22, 4294967280  ;;  %p21_p4 = scmp.ge.s32.totalorder %s786_s28, 4   ;;  %s954_s23 = smov %s705_s24 }
 0x15f   : > { %s955_s24 = smov %s709_s25  ;;  %s956_s25 = smov %s798_s7 }
 0x160   : > { %s957_s26 = smov %s786_s28  ;;  %23 = sbr.rel (!%p21_p4) target bundleno = 8 (0x8), region = 92 }
 0x167   :  { %471 = vsyncpa [#allocation4], 1 }
 0x168   :  { %473 = vsyncpa [#allocation4 + $0x1], 1 }
 0x169   :  { %474 = vsyncpa [#allocation5], 1 }
 0x16a   :  { %476 = vsyncpa [#allocation5 + $0x1], 1 }

</bundles_post_ra>
